<compile_context>
chip_gen: v5e
topology: v5e:2x2
jax: 0.10.0
libtpu: 0.0.40
codegen_flags: <defaults>
</compile_context>

<pallas_src>
import math
import functools

import jax
import jax.numpy as jnp
from jax import lax
from jax.experimental import pallas as pl
from jax.experimental.pallas import tpu as pltpu


def _self_attention_kernel(x_ref, wq_ref, bq_ref, wkv_ref, bkv_ref,
                           ctx_ref, probs_ref, kv_ref,
                           *, hidden_p, q_tile, scale):
    Hp = hidden_p
    qi = pl.program_id(1)

    # --- K/V projection: once per batch element, stored bf16 in persistent
    # VMEM scratch; all later query tiles (qi > 0) reuse it. ---
    @pl.when(qi == 0)
    def _():
        x_full = x_ref[0]                                            # (S, Hp) bf16
        kv = jnp.dot(x_full, wkv_ref[...],
                     preferred_element_type=jnp.float32) + bkv_ref[...]
        kv_ref[...] = kv.astype(jnp.bfloat16)                        # single cast

    # --- Q projection for this query tile (rows sliced from the resident x block). ---
    start = pl.multiple_of(qi * q_tile, q_tile)
    xq = x_ref[0, pl.ds(start, q_tile), :]                           # (tq, Hp) bf16
    q = jnp.dot(xq, wq_ref[...], preferred_element_type=jnp.float32) + bq_ref[...]
    q = (q * scale).astype(jnp.bfloat16)                             # fold 1/sqrt(H) into q

    k = kv_ref[:, :Hp]                                               # (S, Hp) bf16
    # scores = q @ k^T with no in-kernel transpose: contract last dims of both.
    scores = lax.dot_general(q, k,
                             dimension_numbers=(((1,), (1,)), ((), ())),
                             preferred_element_type=jnp.float32)     # (tq, S) f32

    # Numerically stable softmax in f32 (portable across v5e/v6e/v7x).
    m = jnp.max(scores, axis=-1, keepdims=True)
    e = jnp.exp(scores - m)
    denom = jnp.sum(e, axis=-1, keepdims=True)
    probs = e * pl.reciprocal(denom, approx=True)   # EUP slot; ~1e-3 rel err in probs

    # Dropout omitted (identity, eval mode).
    probs_ref[0] = probs.astype(probs_ref.dtype)

    # The module only returns ctx[:, 0, :]; row 0 lives in the first query tile.
    @pl.when(qi == 0)
    def _():
        v = kv_ref[:, Hp:].astype(jnp.float32)                       # (S, Hp)
        ctx = jnp.dot(probs[0:1, :], v, preferred_element_type=jnp.float32)
        ctx_ref[0] = ctx.astype(ctx_ref.dtype)


def _generation_params():
    """(query-tile cap, vmem_limit_bytes) per TPU generation."""
    kind = ""
    try:
        kind = jax.devices()[0].device_kind.lower()
    except Exception:
        pass
    if "v7" in kind or "7x" in kind:
        return 256, 48 * 1024 * 1024    # 64 MiB physical VMEM -> conservative
    if "v6" in kind:
        return 1024, 96 * 1024 * 1024   # 128 MiB physical
    if "v5" in kind:
        return 512, 96 * 1024 * 1024    # 128 MiB physical, 128-wide MXU
    return 256, 48 * 1024 * 1024        # unknown: be conservative


def _choose_query_tile(seq_len, hidden_p, cap, budget_bytes):
    """Largest query tile (multiple of 8, dividing seq_len) whose per-step VMEM
    working set fits the budget, capped per TPU generation."""
    def footprint(tq):
        x_blk = 2 * seq_len * hidden_p * 2            # x block, bf16, double-buffered
        kv_scr = seq_len * 2 * hidden_p * 2           # persistent bf16 KV scratch
        probs_out = 2 * tq * seq_len * 4              # probs block, f32, double-buffered
        interm = 3 * tq * seq_len * 4                 # scores / exp / probs f32 temporaries
        weights = 2 * (hidden_p * hidden_p + hidden_p * 2 * hidden_p) * 2 \
            + 2 * 3 * hidden_p * 4                    # Wq^T, [Wk^T|Wv^T], biases (2 bufs)
        return x_blk + kv_scr + probs_out + interm + weights

    cap = max(8, min(cap, seq_len))
    if seq_len <= cap and footprint(seq_len) <= budget_bytes:
        return seq_len
    tq = (cap // 8) * 8
    while tq >= 16:
        if seq_len % tq == 0 and footprint(tq) <= budget_bytes:
            return tq
        tq -= 8
    # Fallback for awkward sequence lengths: smallest divisor >= 8 (safe VMEM).
    for tq in range(8, seq_len + 1):
        if seq_len % tq == 0:
            return tq
    return seq_len


def self_attention(hidden_states, wq, bq, wk, bk, wv, bv):
    """hidden_states: (B, S, H) f32. Returns (ctx_row0 (B, H), probs (B, 1, S, S))."""
    B, S, H = hidden_states.shape
    scale = 1.0 / math.sqrt(H)      # attention_head_size == hidden_size (1 head)

    # Pad the hidden dim to a lane-aligned multiple of 128; zero-padding is
    # mathematically exact for the attention computation (results sliced back).
    Hp = H if H % 128 == 0 else ((H + 127) // 128) * 128
    padH = Hp - H
    x = hidden_states
    if padH:
        x = jnp.pad(x, ((0, 0), (0, 0), (0, padH)))
        wq = jnp.pad(wq, ((0, padH), (0, padH)))
        wk = jnp.pad(wk, ((0, padH), (0, padH)))
        wv = jnp.pad(wv, ((0, padH), (0, padH)))
        bq = jnp.pad(bq, (0, padH))
        bk = jnp.pad(bk, (0, padH))
        bv = jnp.pad(bv, (0, padH))

    cap, vmem_budget = _generation_params()
    tq = _choose_query_tile(S, Hp, cap, vmem_budget)
    nq = S // tq

    # Wrapper-side (trace-time, XLA) layout prep: pre-transpose, fuse K/V
    # weights, cast MXU operands to bf16. Biases stay f32 (added post-accum).
    x_bf16 = x.astype(jnp.bfloat16)
    wq_t = wq.T.astype(jnp.bfloat16)                                    # (Hp, Hp)
    wkv_t = jnp.concatenate([wk.T, wv.T], axis=1).astype(jnp.bfloat16)  # (Hp, 2Hp)
    bq2 = bq.reshape(1, Hp).astype(jnp.float32)
    bkv2 = jnp.concatenate([bk, bv]).reshape(1, 2 * Hp).astype(jnp.float32)

    kernel = functools.partial(_self_attention_kernel,
                               hidden_p=Hp, q_tile=tq, scale=scale)

    ctx, probs = pl.pallas_call(
        kernel,
        out_shape=(
            jax.ShapeDtypeStruct((B, 1, Hp), jnp.float32),   # ctx row 0 only
            jax.ShapeDtypeStruct((B, S, S), jnp.float32),    # attention probs
        ),
        grid_spec=pltpu.PrefetchScalarGridSpec(
            num_scalar_prefetch=0,
            grid=(B, nq),
            in_specs=[
                pl.BlockSpec((1, S, Hp), lambda b, qi: (b, 0, 0)),     # x (resident across qi)
                pl.BlockSpec((Hp, Hp), lambda b, qi: (0, 0)),          # Wq^T
                pl.BlockSpec((1, Hp), lambda b, qi: (0, 0)),           # bq
                pl.BlockSpec((Hp, 2 * Hp), lambda b, qi: (0, 0)),      # [Wk^T | Wv^T]
                pl.BlockSpec((1, 2 * Hp), lambda b, qi: (0, 0)),       # [bk | bv]
            ],
            out_specs=[
                pl.BlockSpec((1, 1, Hp), lambda b, qi: (b, 0, 0)),     # ctx (row 0)
                pl.BlockSpec((1, tq, S), lambda b, qi: (b, qi, 0)),    # probs
            ],
            scratch_shapes=[pltpu.VMEM((S, 2 * Hp), jnp.bfloat16)],    # persistent KV
        ),
        compiler_params=pltpu.CompilerParams(
            dimension_semantics=("parallel", "arbitrary"),
            vmem_limit_bytes=vmem_budget),
    )(x_bf16, wq_t, bq2, wkv_t, bkv2)

    # Match the PyTorch return values:
    #   context_layer[:, 0, :] and attention_probs of shape (B, num_heads=1, S, S)
    return ctx.reshape(B, Hp)[:, :H], probs.reshape(B, 1, S, S)


def _reference(hidden_states, wq, bq, wk, bk, wv, bv):
    """Pure-JAX f32 reference mirroring the PyTorch forward (eval mode)."""
    B, S, H = hidden_states.shape
    q = hidden_states @ wq.T + bq
    k = hidden_states @ wk.T + bk
    v = hidden_states @ wv.T + bv
    scores = jnp.einsum("bqd,bkd->bqk", q, k) / math.sqrt(H)
    probs = jax.nn.softmax(scores, axis=-1)
    ctx = jnp.einsum("bqk,bkd->bqd", probs, v)
    return ctx[:, 0, :], probs.reshape(B, 1, S, S)


if __name__ == "__main__":
    B, S, H = 2, 8, 32   # batch, seq, hidden_size

    key = jax.random.PRNGKey(0)
    kx, kq, kbq, kk, kbk, kv, kbv = jax.random.split(key, 7)

    hidden_states = jax.random.normal(kx, (B, S, H), dtype=jnp.float32)

    # Deterministic params mimicking nn.Linear's uniform(-1/sqrt(H), 1/sqrt(H))
    bound = 1.0 / math.sqrt(H)
    wq = jax.random.uniform(kq, (H, H), jnp.float32, -bound, bound)
    bq = jax.random.uniform(kbq, (H,), jnp.float32, -bound, bound)
    wk = jax.random.uniform(kk, (H, H), jnp.float32, -bound, bound)
    bk = jax.random.uniform(kbk, (H,), jnp.float32, -bound, bound)
    wv = jax.random.uniform(kv, (H, H), jnp.float32, -bound, bound)
    bv = jax.random.uniform(kbv, (H,), jnp.float32, -bound, bound)

    ctx0, probs = self_attention(hidden_states, wq, bq, wk, bk, wv, bv)
    jax.block_until_ready((ctx0, probs))

    ref_ctx0, ref_probs = _reference(hidden_states, wq, bq, wk, bk, wv, bv)
    assert ctx0.shape == (B, H)
    assert probs.shape == (B, 1, S, S)
    # Tolerances account for bf16 MXU operands (f32 accumulation) + approx recip.
    assert jnp.allclose(ctx0, ref_ctx0, atol=2e-2, rtol=2e-2)
    assert jnp.allclose(probs, ref_probs, atol=1e-2, rtol=1e-2)

    print("KERNEL_OK")
</pallas_src>

<mosaic_0001>
module attributes {stable_mosaic.version = 11 : i64} {
  func.func @_self_attention_kernel(%arg0: i32, %arg1: i32, %arg2: memref<1x8x128xbf16, #tpu.memory_space<vmem>>, %arg3: memref<128x128xbf16, #tpu.memory_space<vmem>>, %arg4: memref<1x128xf32, #tpu.memory_space<vmem>>, %arg5: memref<128x256xbf16, #tpu.memory_space<vmem>>, %arg6: memref<1x256xf32, #tpu.memory_space<vmem>>, %arg7: memref<1x1x128xf32, #tpu.memory_space<vmem>>, %arg8: memref<1x8x8xf32, #tpu.memory_space<vmem>>, %arg9: memref<8x256xbf16, #tpu.memory_space<vmem>>) attributes {dimension_semantics = [#tpu.dimension_semantics<parallel>, #tpu.dimension_semantics<arbitrary>], iteration_bounds = array<i64: 2, 1>, scalar_prefetch = 0 : i64, scratch_operands = 1 : i64, tpu.core_type = #tpu.core_type<tc>, window_params = [{transform_indices = @transform_0, window_bounds = array<i64: 1, 8, 128>}, {pipeline_mode = #tpu.pipeline_mode<synchronous>, transform_indices = @transform_1, window_bounds = array<i64: 128, 128>}, {pipeline_mode = #tpu.pipeline_mode<synchronous>, transform_indices = @transform_2, window_bounds = array<i64: 1, 128>}, {pipeline_mode = #tpu.pipeline_mode<synchronous>, transform_indices = @transform_3, window_bounds = array<i64: 128, 256>}, {pipeline_mode = #tpu.pipeline_mode<synchronous>, transform_indices = @transform_4, window_bounds = array<i64: 1, 256>}, {transform_indices = @transform_5, window_bounds = array<i64: 1, 1, 128>}, {transform_indices = @transform_6, window_bounds = array<i64: 1, 8, 8>}]} {
    %c0_i32 = arith.constant 0 : i32
    %0 = arith.cmpi eq, %arg1, %c0_i32 : i32
    %1 = arith.extui %0 : i1 to i32
    %c0_i32_0 = arith.constant 0 : i32
    %2 = arith.cmpi ne, %1, %c0_i32_0 : i32
    scf.if %2 {
      %c0_17 = arith.constant 0 : index
      %c0_18 = arith.constant 0 : index
      %c0_19 = arith.constant 0 : index
      %34 = vector.load %arg2[%c0_17, %c0_18, %c0_19] : memref<1x8x128xbf16, #tpu.memory_space<vmem>>, vector<1x8x128xbf16>
      %35 = vector.shape_cast %34 : vector<1x8x128xbf16> to vector<8x128xbf16>
      %c0_20 = arith.constant 0 : index
      %c0_21 = arith.constant 0 : index
      %36 = vector.load %arg5[%c0_20, %c0_21] : memref<128x256xbf16, #tpu.memory_space<vmem>>, vector<128x256xbf16>
      %cst_22 = arith.constant dense<0.000000e+00> : vector<8x256xf32>
      %37 = tpu.matmul %35, %36, %cst_22 {dimension_numbers = #tpu.dot_dimension_numbers<[1], [0], [0], [1], [0, 0, 1, 1], [], []>} : vector<8x128xbf16>, vector<128x256xbf16>, vector<8x256xf32> -> vector<8x256xf32>
      %c0_23 = arith.constant 0 : index
      %c0_24 = arith.constant 0 : index
      %38 = vector.load %arg6[%c0_23, %c0_24] : memref<1x256xf32, #tpu.memory_space<vmem>>, vector<1x256xf32>
      %39 = vector.broadcast %38 : vector<1x256xf32> to vector<8x256xf32>
      %40 = arith.addf %37, %39 : vector<8x256xf32>
      %41 = arith.truncf %40 : vector<8x256xf32> to vector<8x256xbf16>
      %c0_25 = arith.constant 0 : index
      %c0_26 = arith.constant 0 : index
      %42 = vector.load %arg9[%c0_25, %c0_26] : memref<8x256xbf16, #tpu.memory_space<vmem>>, vector<8x256xbf16>
      tpu.vector_store %arg9[%c0_25, %c0_26], %41 {strides = array<i32>} : memref<8x256xbf16, #tpu.memory_space<vmem>>, vector<8x256xbf16>,
    } else {
    }
    %c8_i32 = arith.constant 8 : i32
    %3 = arith.muli %arg1, %c8_i32 : i32
    %4 = tpu.assume_multiple %3, 8 : i32
    %c0 = arith.constant 0 : index
    %5 = arith.index_cast %4 : i32 to index
    %c0_1 = arith.constant 0 : index
    %6 = vector.load %arg2[%c0, %5, %c0_1] : memref<1x8x128xbf16, #tpu.memory_space<vmem>>, vector<1x8x128xbf16>
    %7 = vector.shape_cast %6 : vector<1x8x128xbf16> to vector<8x128xbf16>
    %c0_2 = arith.constant 0 : index
    %c0_3 = arith.constant 0 : index
    %8 = vector.load %arg3[%c0_2, %c0_3] : memref<128x128xbf16, #tpu.memory_space<vmem>>, vector<128x128xbf16>
    %cst = arith.constant dense<0.000000e+00> : vector<8x128xf32>
    %9 = tpu.matmul %7, %8, %cst {dimension_numbers = #tpu.dot_dimension_numbers<[1], [0], [0], [1], [0, 0, 1, 1], [], []>} : vector<8x128xbf16>, vector<128x128xbf16>, vector<8x128xf32> -> vector<8x128xf32>
    %c0_4 = arith.constant 0 : index
    %c0_5 = arith.constant 0 : index
    %10 = vector.load %arg4[%c0_4, %c0_5] : memref<1x128xf32, #tpu.memory_space<vmem>>, vector<1x128xf32>
    %11 = vector.broadcast %10 : vector<1x128xf32> to vector<8x128xf32>
    %12 = arith.addf %9, %11 : vector<8x128xf32>
    %cst_6 = arith.constant 0.176776692 : f32
    %13 = vector.broadcast %cst_6 : f32 to vector<8x128xf32>
    %14 = arith.mulf %12, %13 : vector<8x128xf32>
    %15 = arith.truncf %14 : vector<8x128xf32> to vector<8x128xbf16>
    %c0_7 = arith.constant 0 : index
    %c0_8 = arith.constant 0 : index
    %16 = vector.load %arg9[%c0_7, %c0_8] : memref<8x256xbf16, #tpu.memory_space<vmem>>, vector<8x128xbf16>
    %cst_9 = arith.constant dense<0.000000e+00> : vector<8x8xf32>
    %17 = tpu.matmul %15, %16, %cst_9 {dimension_numbers = #tpu.dot_dimension_numbers<[1], [1], [0], [0], [0, 0, 1, 0], [], []>} : vector<8x128xbf16>, vector<8x128xbf16>, vector<8x8xf32> -> vector<8x8xf32>
    %cst_10 = arith.constant dense<0xFF800000> : vector<8xf32>
    %18 = vector.multi_reduction <maximumf>, %17, %cst_10 [1] : vector<8x8xf32> to vector<8xf32>
    %19 = vector.shape_cast %18 : vector<8xf32> to vector<8x1xf32>
    %20 = vector.broadcast %19 : vector<8x1xf32> to vector<8x8xf32>
    %21 = arith.subf %17, %20 : vector<8x8xf32>
    %22 = math.exp %21 : vector<8x8xf32>
    %cst_11 = arith.constant dense<0.000000e+00> : vector<8xf32>
    %23 = vector.multi_reduction <add>, %22, %cst_11 [1] : vector<8x8xf32> to vector<8xf32>
    %24 = vector.shape_cast %23 : vector<8xf32> to vector<8x1xf32>
    %25 = tpu.reciprocal %24 {approx = true} : vector<8x1xf32> -> vector<8x1xf32>
    %26 = vector.broadcast %25 : vector<8x1xf32> to vector<8x8xf32>
    %27 = arith.mulf %22, %26 : vector<8x8xf32>
    %c0_12 = arith.constant 0 : index
    %c0_13 = arith.constant 0 : index
    %c0_14 = arith.constant 0 : index
    %28 = vector.load %arg8[%c0_12, %c0_13, %c0_14] : memref<1x8x8xf32, #tpu.memory_space<vmem>>, vector<1x8x8xf32>
    %29 = vector.shape_cast %28 : vector<1x8x8xf32> to vector<8x8xf32>
    %30 = vector.shape_cast %27 : vector<8x8xf32> to vector<1x8x8xf32>
    tpu.vector_store %arg8[%c0_12, %c0_13, %c0_14], %30 {strides = array<i32>} : memref<1x8x8xf32, #tpu.memory_space<vmem>>, vector<1x8x8xf32>,
    %c0_i32_15 = arith.constant 0 : i32
    %31 = arith.cmpi eq, %arg1, %c0_i32_15 : i32
    %32 = arith.extui %31 : i1 to i32
    %c0_i32_16 = arith.constant 0 : i32
    %33 = arith.cmpi ne, %32, %c0_i32_16 : i32
    scf.if %33 {
      %c0_17 = arith.constant 0 : index
      %c128 = arith.constant 128 : index
      %34 = vector.load %arg9[%c0_17, %c128] : memref<8x256xbf16, #tpu.memory_space<vmem>>, vector<8x128xbf16>
      %35 = arith.extf %34 : vector<8x128xbf16> to vector<8x128xf32>
      %36 = vector.extract_strided_slice %27 {offsets = [0, 0], sizes = [1, 8], strides = [1, 1]} : vector<8x8xf32> to vector<1x8xf32>
      %cst_18 = arith.constant dense<0.000000e+00> : vector<1x128xf32>
      %37 = tpu.matmul %36, %35, %cst_18 {dimension_numbers = #tpu.dot_dimension_numbers<[1], [0], [0], [1], [0, 0, 1, 1], [], []>} : vector<1x8xf32>, vector<8x128xf32>, vector<1x128xf32> -> vector<1x128xf32>
      %c0_19 = arith.constant 0 : index
      %c0_20 = arith.constant 0 : index
      %c0_21 = arith.constant 0 : index
      %38 = vector.load %arg7[%c0_19, %c0_20, %c0_21] : memref<1x1x128xf32, #tpu.memory_space<vmem>>, vector<1x1x128xf32>
      %39 = vector.shape_cast %38 : vector<1x1x128xf32> to vector<1x128xf32>
      %40 = vector.shape_cast %37 : vector<1x128xf32> to vector<1x1x128xf32>
      tpu.vector_store %arg7[%c0_19, %c0_20, %c0_21], %40 {strides = array<i32>} : memref<1x1x128xf32, #tpu.memory_space<vmem>>, vector<1x1x128xf32>,
    } else {
    }
    return
  }
  func.func @transform_0(%arg0: i32, %arg1: i32) -> (i32, i32, i32) {
    %c0_i32 = arith.constant 0 : i32
    %c0_i32_0 = arith.constant 0 : i32
    %c0_i32_1 = arith.constant 0 : i32
    return %arg0, %c0_i32, %c0_i32_0 : i32, i32, i32
  }
  func.func @transform_1(%arg0: i32, %arg1: i32) -> (i32, i32) {
    %c0_i32 = arith.constant 0 : i32
    %c0_i32_0 = arith.constant 0 : i32
    %c0_i32_1 = arith.constant 0 : i32
    return %c0_i32, %c0_i32_0 : i32, i32
  }
  func.func @transform_2(%arg0: i32, %arg1: i32) -> (i32, i32) {
    %c0_i32 = arith.constant 0 : i32
    %c0_i32_0 = arith.constant 0 : i32
    %c0_i32_1 = arith.constant 0 : i32
    return %c0_i32, %c0_i32_0 : i32, i32
  }
  func.func @transform_3(%arg0: i32, %arg1: i32) -> (i32, i32) {
    %c0_i32 = arith.constant 0 : i32
    %c0_i32_0 = arith.constant 0 : i32
    %c0_i32_1 = arith.constant 0 : i32
    return %c0_i32, %c0_i32_0 : i32, i32
  }
  func.func @transform_4(%arg0: i32, %arg1: i32) -> (i32, i32) {
    %c0_i32 = arith.constant 0 : i32
    %c0_i32_0 = arith.constant 0 : i32
    %c0_i32_1 = arith.constant 0 : i32
    return %c0_i32, %c0_i32_0 : i32, i32
  }
  func.func @transform_5(%arg0: i32, %arg1: i32) -> (i32, i32, i32) {
    %c0_i32 = arith.constant 0 : i32
    %c0_i32_0 = arith.constant 0 : i32
    %c0_i32_1 = arith.constant 0 : i32
    return %arg0, %c0_i32, %c0_i32_0 : i32, i32, i32
  }
  func.func @transform_6(%arg0: i32, %arg1: i32) -> (i32, i32, i32) {
    %c0_i32 = arith.constant 0 : i32
    %c0_i32_0 = arith.constant 0 : i32
    return %arg0, %arg1, %c0_i32 : i32, i32, i32
  }
}

</mosaic_0001>

<bundles_post_ra>
// kernel: tpu_custom_call.1
= control target key start
LH: loop header
LB: loop body
LE: loop exit
PB: predicated region body
PF: predicated region fallthrough
CT: control target
= control target key end

     0   :  { %s1430_s0 = inlined_call_operand.hbm [shape: bf16[2,8,128], index: 0, kind: input, shape index: {}]   ;;  %s1431_s1 = inlined_call_operand.hbm [shape: bf16[128,128], index: 1, kind: input, shape index: {}]   ;;  %s1432_s2 = inlined_call_operand.vmem [shape: f32[1,128], index: 2, kind: input, shape index: {}]   ;;  %s1433_s3 = inlined_call_operand.hbm [shape: bf16[128,256], index: 3, kind: input, shape index: {}]   ;;  %s1434_s4 = inlined_call_operand.vmem [shape: f32[1,256], index: 4, kind: input, shape index: {}]   ;;  %s1435_s5 = inlined_call_operand.hbm [shape: f32[2,1,128], index: 5, kind: output, shape index: {0}]   ;;  %s1436_s6 = inlined_call_operand.hbm [shape: f32[2,8,8], index: 6, kind: output, shape index: {1}]  }
   0x1   :  { %1437 = sst [smem:[#allocation16_spill]] %s1430_s0 }
   0x2   :  { %1438 = sst [smem:[#allocation17_spill]] %s1431_s1 }
   0x3   :  { %12 = vsyncpa [#allocation4], 0 }
   0x4   :  { %14 = vsyncpa [#allocation4 + $0x1], 0 }
   0x5   :  { %15 = vsyncpa [#allocation7], 0 }
   0x6   :  { %16 = vsyncpa [#allocation5], 0 }
   0x7   :  { %18 = vsyncpa [#allocation5 + $0x1], 0 }
   0x8   :  { %19 = vsyncpa [#allocation11], 0 }
   0x9   :  { %21 = vsyncpa [#allocation11 + $0x1], 0  ;;  %s1255_s21 = smov 0   ;;  %s1257_s22 = smov 0  }
   0xa   :  { %s1259_s23 = smov 0   ;;  %s1261_s24 = smov 0  }
   0xb   :  { %s1263_s25 = smov 0   ;;  %s1265_s26 = smov 0  }
   0xc LB: > { %s769_s27 = sadd.s32 4294967295, %s1212_s26   ;;  %p771_p0 = scmp.ge.s32.totalorder %s1212_s26, 1  ;;  %s1212_s26 = sphi %s1265_s26, %s27_s26   ;;  %s1208_s25 = sphi %s1263_s25, %s1450_s25   ;;  %s1204_s24 = sphi %s1261_s24, %s1449_s24   ;;  %s1200_s23 = sphi %s1259_s23, %s1448_s23   ;;  %s1196_s22 = sphi %s1257_s22, %s1447_s22   ;;  %s1192_s21 = sphi %s1255_s21, %s1446_s21  }
   0xd   : > { %p1289_p1 = scmp.eq.s32.totalorder %s769_s27, 0  ;;  %p208_p2 = scmp.lt.s32.totalorder %s1212_s26, 3 }
   0xe   : > { %s1440_s1 = sld [smem:[#allocation17_spill]]  ;;  %s1214_s9 = smov [#allocation6]  }
   0xf   : > { %p1297_p3 = pnand %p771_p0, %p208_p2  ;;  %s221_s10 = sshll.u32 %s1214_s9, 4  ;;  %s222_s10 = int_to_ptr.vmem [resolvable:$true] %s221_s10 }
  0x10   : > { %p774_p6 = scmp.ge.s32.totalorder %s1212_s26, 2  ;;  %s236_s13 = sshll.u32 %s1433_s3, 4  ;;  %s237_s13 = int_to_ptr.hbm [resolvable:$true] %s236_s13 }
  0x11   : > { %p921_p4 = pneg %p1297_p3  ;;  %s1215_s14 = smov 64  }
  0x12   : > { %s1216_s15 = smov 4   ;;  %s1217_s16 = smov [#allocation8]  }
  0x13   : > { %p922_p5 = pnand %p921_p4, %p1289_p1  ;;  %s238_s17 = sshll.u32 %s1217_s16, 4  ;;  %s239_s17 = int_to_ptr.vmem [resolvable:$true] %s238_s17 }
  0x14   : > { %s219_s7 = sshll.u32 %s1440_s1, 4  ;;  %s1218_s18 = smov 128   ;;  %s220_s7 = int_to_ptr.hbm [resolvable:$true] %s219_s7 }
  0x15   : > { %924 = dma.hbm_to_vmem [thread:$0]  (!%p922_p5), %s220_s7, 1024, %s222_s10, [#allocation7], %s1215_s14, %s1215_s14, %s1216_s15  }
  0x16   : > { %s1219_s19 = smov 8   ;;  %s39_s20 = sadd.s32 1, %s1208_s25 }
  0x17   : > { %927 = dma.hbm_to_vmem [thread:$0]  (!%p922_p5), %s237_s13, 2048, %s239_s17, [#allocation7], %s1218_s18, %s1218_s18, %s1219_s19  }
  0x18   : > { %s770_s29 = sadd.s32 4294967294, %s1212_s26   ;;  %p41_p7 = scmp.ge.s32.totalorder %s39_s20, 2 }
  0x19   : > { %s46_s30 = sadd.s32 1, %s1200_s23  ;;  %p53_p8 = scmp.ne.s32.totalorder %s1200_s23, %s1196_s22 }
  0x1a   : > { %s1452_s20 = smov (%p41_p7, %s39_s20), 0  ;;  %p54_p9 = scmp.eq.s32.totalorder %s1212_s26, 0 }
  0x1b   : > { %p59_p10 = scmp.ne.s32.totalorder %s1196_s22, %s1192_s21  ;;  %s43_s7 = ssub.s32 %s1208_s25, %s1452_s20 }
  0x1c   : > { %p167_p11 = scmp.eq.s32.totalorder %s769_s27, 1  ;;  %p44_p12 = scmp.eq.s32.totalorder %s43_s7, 0 }
  0x1d   : > { %p1325_p13 = por %p1289_p1, %p59_p10  ;;  %p173_p2 = scmp.eq.s32.totalorder %s770_s29, 1 }
  0x1e   : > { %p1329_p0 = por %p167_p11, %p53_p8  ;;  %p55_p4 = por %p54_p9, %p53_p8 }
  0x1f   : > { %s1334_s11 = scalar_select %p44_p12, %s1200_s23, %s46_s30  }
  0x20   : > { %p1336_p5 = por %p173_p2, %p59_p10  ;;  %s255_s13 = sand.u32 1, %s1200_s23  }
  0x21   : > { %s776_s27 = sshll.u32 %s1208_s25, 2  ;;  %p941_p7 = scmp.lt.s32.totalorder %s1212_s26, 2 }
  0x22   : > { %s775_s14 = sshll.u32 %s255_s13, 2  ;;  %s1445_s0 = sld [smem:[#allocation16_spill]] }
  0x23   : > { %s259_s19 = scalar_lea.vmem [#allocation3], %s775_s14  ;;  %p929_p11 = pnand %p941_p7, %p55_p4 }
  0x24   : > { %s267_s7 = sshll.u32 %s259_s19, 4  ;;  %s256_s29 = scalar_lea.sflag [#allocation4], %s255_s13  ;;  %s268_s7 = int_to_ptr.vmem [resolvable:$true] %s267_s7 }
  0x25   : > { %s1349_s30 = sand.u32 (!%p1297_p3), 1, %s1196_s22  }
  0x26   : > { %276 = sbr.rel (%p1297_p3) target bundleno = 747 (0x2eb), region = 40  ;;  %s778_s1 = sshll.u32 (!%p1297_p3), %s1349_s30, 2 }
  0x27   : > { %s279_s15 = scalar_lea.sflag (!%p1297_p3), [#allocation4], %s1349_s30 }
  0x28   : > { %s263_s17 = scalar_lea.hbm %s1445_s0, %s776_s27  ;;  %s1353_s27 = scalar_lea.vmem (!%p1297_p3), [#allocation3], %s778_s1 }
  0x29   : > { %s265_s18 = sshll.u32 %s263_s17, 4  ;;  %s266_s18 = int_to_ptr.hbm [resolvable:$true] %s265_s18 }
  0x2a   : > { %931 = dma.hbm_to_vmem [thread:$0]  (!%p929_p11), %s266_s18, 64, %s268_s7, %s256_s29  }
  0x2b   : > { %1175 = dma.done.wait (%p1325_p13), %s279_s15, 64  }
  0x2c   : > { %1177 = vsyncadd (%p1325_p13), %s279_s15, 4294967232 }
  0x2d   : > { %1179 = dma.done.wait (%p1289_p1), [#allocation7], 3072  }
  0x2e   : > { %1181 = vsyncadd (%p1289_p1), [#allocation7], 4294964224  ;;  %v840_v0 = vld [vmem:[#allocation8 + $0x70] sm:$0xf]  ;;  %v898_v1 = vld [vmem:[#allocation8 + $0x74] sm:$0xf0] }
  0x2f   : > { %v897_v2 = vld [vmem:[#allocation8 + $0x74] sm:$0xf]  ;;  %v841_v3 = vor.u32 %v898_v1, %v840_v0  ;;  %v842_v4 = vld [vmem:[#allocation8 + $0x78] sm:$0xf0]  ;;  %v832_v6 = vld [vmem:[#allocation8 + $0x60] sm:$0xf] }
  0x30   : > { %v906_v5 = vld [vmem:[#allocation6 + $0x38] sm:$0xff]  ;;  %v845_v7 = vor.u32 %v897_v2, %v842_v4  ;;  %v896_v8 = vld [vmem:[#allocation8 + $0x64] sm:$0xf0]  ;;  %v895_v9 = vld [vmem:[#allocation8 + $0x64] sm:$0xf]  ;;  %vm565_vm0 = vcmask 64512  }
  0x31   : > { %v834_v10 = vld [vmem:[#allocation8 + $0x68] sm:$0xf0]  ;;  %434 = vmatpush.bf16.msra.mxu0 %v841_v3  ;;  %536 = vmatpush.bf16.msra.mxu2 %v906_v5  ;;  %v833_v11 = vor.u32 %v896_v8, %v832_v6  ;;  %v905_v12 = vld [vmem:[#allocation6 + $0x30] sm:$0xff]  ;;  %v894_v15 = vld [vmem:[#allocation8 + $0x54] sm:$0xf0]  ;;  %s781_s13 = sshll.u32 %s1349_s30, 3 }
  0x32   : > { %447 = vmatpush.bf16.msra.mxu1 %v845_v7  ;;  %v837_v13 = vor.u32 %v895_v9, %v834_v10  ;;  %v824_v14 = vld [vmem:[#allocation8 + $0x50] sm:$0xf]  ;;  %v893_v16 = vld [vmem:[#allocation8 + $0x54] sm:$0xf]  ;;  %v826_v17 = vld [vmem:[#allocation8 + $0x58] sm:$0xf0] }
  0x33   : > { %v825_v18 = vor.u32 %v894_v15, %v824_v14  ;;  %v904_v19 = vld [vmem:[#allocation6 + $0x28] sm:$0xff]  ;;  %v829_v20 = vor.u32 %v893_v16, %v826_v17  ;;  %v816_v21 = vld [vmem:[#allocation8 + $0x40] sm:$0xf]  ;;  %v891_v23 = vld [vmem:[#allocation8 + $0x44] sm:$0xf]  ;;  %s325_s14 = scalar_lea.vmem [#allocation10], %s781_s13 }
  0x34   : > { %v892_v22 = vld [vmem:[#allocation8 + $0x44] sm:$0xf0]  ;;  %v818_v24 = vld [vmem:[#allocation8 + $0x48] sm:$0xf0]  ;;  %v903_v26 = vld [vmem:[#allocation6 + $0x20] sm:$0xff]  ;;  %s880_s16 = sshll.u32 %s1204_s24, 3 }
  0x35   : > { %435 = vmatpush.bf16.msra.mxu0 %v833_v11  ;;  %537 = vmatpush.bf16.msra.mxu2 %v905_v12  ;;  %v817_v25 = vor.u32 %v892_v22, %v816_v21  ;;  %v821_v27 = vor.u32 %v891_v23, %v818_v24  ;;  %v808_v28 = vld [vmem:[#allocation8 + $0x30] sm:$0xf]  ;;  %v890_v29 = vld [vmem:[#allocation8 + $0x34] sm:$0xf0]  ;;  %v889_v30 = vld [vmem:[#allocation8 + $0x34] sm:$0xf]  ;;  %s636_s19 = scalar_lea.hbm %s1436_s6, %s880_s16 }
  0x36   : > { %448 = vmatpush.bf16.msra.mxu1 %v837_v13  ;;  %v810_v31 = vld [vmem:[#allocation8 + $0x38] sm:$0xf0]  ;;  %v809_v32 = vor.u32 %v890_v29, %v808_v28  ;;  %v800_v35 = vld [vmem:[#allocation8 + $0x20] sm:$0xf]  ;;  %v888_v36 = vld [vmem:[#allocation8 + $0x24] sm:$0xf0] }
  0x37   : > { %v902_v33 = vld [vmem:[#allocation6 + $0x18] sm:$0xff]  ;;  %v813_v34 = vor.u32 %v889_v30, %v810_v31  ;;  %v887_v37 = vld [vmem:[#allocation8 + $0x24] sm:$0xf]  ;;  %v802_v38 = vld [vmem:[#allocation8 + $0x28] sm:$0xf0]  ;;  %v801_v39 = vor.u32 %v888_v36, %v800_v35  ;;  %s638_s7 = sshll.u32 %s325_s14, 4  ;;  %s639_s7 = int_to_ptr.vmem [resolvable:$true] %s638_s7 }
  0x38   : > { %v901_v40 = vld [vmem:[#allocation6 + $0x10] sm:$0xff]  ;;  %v805_v41 = vor.u32 %v887_v37, %v802_v38  ;;  %v886_v43 = vld [vmem:[#allocation8 + $0x14] sm:$0xf0]  ;;  %v794_v45 = vld [vmem:[#allocation8 + $0x18] sm:$0xf0]  ;;  %s640_s29 = sshll.u32 %s636_s19, 4  ;;  %s641_s29 = int_to_ptr.hbm [resolvable:$true] %s640_s29 }
  0x39   : > { %436 = vmatpush.bf16.msra.mxu0 %v825_v18  ;;  %538 = vmatpush.bf16.msra.mxu2 %v904_v19  ;;  %v792_v42 = vld [vmem:[#allocation8 + $0x10] sm:$0xf]  ;;  %v885_v44 = vld [vmem:[#allocation8 + $0x14] sm:$0xf]  ;;  %v900_v47 = vld [vmem:[#allocation6 + $0x8] sm:$0xff]  ;;  %s612_s15 = scalar_lea.sflag [#allocation11], %s1349_s30 }
  0x3a   : > { %449 = vmatpush.bf16.msra.mxu1 %v829_v20  ;;  %v793_v46 = vor.u32 %v886_v43, %v792_v42  ;;  %v797_v48 = vor.u32 %v885_v44, %v794_v45  ;;  %v784_v49 = vld [vmem:[#allocation8] sm:$0xf]  ;;  %v884_v50 = vld [vmem:[#allocation8 + $0x4] sm:$0xf0]  ;;  %v883_v51 = vld [vmem:[#allocation8 + $0x4] sm:$0xf] }
  0x3b   : > { %v786_v52 = vld [vmem:[#allocation8 + $0x8] sm:$0xf0]  ;;  %v785_v53 = vor.u32 %v884_v50, %v784_v49  ;;  %v899_v54 = vld [vmem:[#allocation6] sm:$0xff]  ;;  %v331_v56 = vld [vmem:[%s1353_s27] sm:$0xf]  ;;  %s1114_s9 = scalar_lea.hbm %s1436_s6, 16 }
  0x3c   : > { %v789_v55 = vor.u32 %v883_v51, %v786_v52  ;;  %v467_v57 = vld [vmem:[%s1353_s27] sm:$0xf]  ;;  %v348_v58 = vld [vmem:[%s1434_s4] sm:$0x3]  ;;  %s1108_s27 = sshra.s32 %s641_s29, 4  ;;  %s1109_s27 = int_to_ptr.hbm [resolvable:$true] %s1108_s27 }
  0x3d   : > { %437 = vmatpush.bf16.msra.mxu0 %v817_v25  ;;  %539 = vmatpush.bf16.msra.mxu2 %v903_v26  ;;  %v350_v59 = vperm.slane %v348_v58, 0  ;;  %v351_v60 = vperm.slane %v348_v58, 1  ;;  %v999_v2 = vld [vmem:[%s1432_s2] ss:$0 sm:$0xff]  ;;  %s1110_s1 = scalar_lea.hbm %s1109_s27, 8  ;;  %p1115_p9 = scmp.lt.s32.totalorder %s1109_s27, %s1436_s6 }
  0x3e   : > { %450 = vmatpush.bf16.msra.mxu1 %v821_v27  ;;  %p1111_p1 = scmp.ne.s32.totalorder %s1109_s27, %s1110_s1  ;;  %p1116_p10 = scmp.lt.s32.totalorder %s1114_s9, %s1110_s1 }
  0x40   : > { %p1112_p3 = pnand %p1111_p1, %p1329_p0  ;;  %p1117_p12 = por %p1116_p10, %p1115_p9 }
  0x41   : > { %438 = vmatpush.bf16.msra.mxu0 %v809_v32  ;;  %540 = vmatpush.bf16.msra.mxu2 %v902_v33 }
  0x42   : > { %451 = vmatpush.bf16.msra.mxu1 %v813_v34  ;;  %p1113_p8 = pneg %p1112_p3 }
  0x44   : > { %p1118_p13 = pnand %p1117_p12, %p1113_p8 }
  0x45   : > { %439 = vmatpush.bf16.msra.mxu0 %v801_v39  ;;  %541 = vmatpush.bf16.msra.mxu2 %v901_v40 }
  0x46   : > { %452 = vmatpush.bf16.msra.mxu1 %v805_v41 }
  0x49   : > { %440 = vmatpush.bf16.msra.mxu0 %v793_v46  ;;  %542 = vmatpush.bf16.msra.mxu2 %v900_v47 }
  0x4a   : > { %453 = vmatpush.bf16.msra.mxu1 %v797_v48 }
  0x4d   : > { %441 = vmatpush.bf16.msra.mxu0 %v785_v53  ;;  %543 = vmatpush.bf16.msra.mxu2 %v899_v54 }
  0x4e   : > { %454 = vmatpush.bf16.msra.mxu1 %v789_v55 }
  0x50   : > { %442 = vmatmul.bf16.vlgmr.msra.gmra.mxu0 %v331_v56  ;;  %544 = vmatmul.bf16.vlgmr.msra.gmra.mxu2 %v467_v57 }
  0x51   : > { %455 = vmatmul.bf16.vlgmr.msra.gmra.mxu1 %v331_v56 }
  0xcd   : > { %v443_v61 = vpop.f32.mrf.mxu0 }
  0xce   : > { %v444_v62 = vadd.f32 %v443_v61, %v350_v59  ;;  %v456_v63 = vpop.f32.mrf.mxu1 }
  0xcf   : > { %v457_v0 = vadd.f32 %v456_v63, %v351_v60 }
  0xd1   : > { %v460_v1 = vpack.c.bf16 %v457_v0, %v444_v62 }
  0xd3   : > { %461 = vst [vmem:[#allocation2] sm:$0xff] %v460_v1  ;;  %v545_v3 = vpop.f32.mrf.mxu2 }
  0xd4   : > { %v546_v5 = vadd.f32 %v999_v2, %v545_v3 }
  0xd5   : > { %v445_v4 = vpop.f32.mrf.mxu0 }
  0xd6   : > { %v458_v6 = vpop.f32.mrf.mxu1  ;;  %v549_v7 = vmul.f32 0.17677669, %v546_v5 }
  0xd8   : > { %v550_v12 = vpack.c.bf16 %v549_v7, %v549_v7 }
  0xda   : > { %v551_v8 = vld [vmem:[#allocation2] sm:$0xf]  ;;  %v581_v9 = vld [vmem:[#allocation2 + $0x4] sm:$0xf] }
  0xdb   : > { %559 = vmatpush.bf16.xpose.msra.mxu3 %v551_v8  ;;  %v547_v10 = vpop.f32.mrf.mxu2  ;;  %v582_v11 = vunpack.c.l.bf16 %v581_v9 }
  0xe2   : > { %560 = vmatmul.bf16.vlgmr.msra.gmra.mxu3 %v550_v12 }
  0xe3   : > { %601 = vmatpush.msrb.mxu3 %v582_v11 }
 0x165   : > { %v561_v13 = vpop.f32.mrf.mxu3 }
 0x166   : > { %v566_v14 = vsel %vm565_vm0, %v561_v13, -inf }
 0x167   : > { %567 = vmax.xlane.f32.xlu0 %v566_v14 }
 0x16d   : > { %v563_v15 = vpop.f32.mrf.mxu3 }
 0x1da   : > { %v568_v16 = vpop.xlane.xlu0 %567 }
 0x1db   : > { %v569_v17 = vsub.f32 %v561_v13, %v568_v16 }
 0x1dd   : > { %v570_v18 = vmul.f32 1.442695, %v569_v17 }
 0x1df   : > { %1000 = vpow2.f32 %v570_v18 }
 0x1e5   : > { %v1001_v19 = vpop.eup %1000 }
 0x1e6   : > { %v572_v20 = vsel %vm565_vm0, %v1001_v19, 0.0 }
 0x1e7   : > { %573 = vadd.xlane.f32.xlu0 %v572_v20 }
 0x25a   : > { %v574_v21 = vpop.xlane.xlu0 %573 }
 0x25b   : > { %1002 = vrcp.f32 %v574_v21 }
 0x261   : > { %v1003_v22 = vpop.eup %1002 }
 0x262   : > { %v576_v23 = vmul.f32 %v1003_v22, %v1001_v19 }
 0x264   : > { %878 = vmatmul.msk.f32.vlgmr.msrb.gmra.mxu3 %vm565_vm0, %v576_v23  ;;  %577 = vst.msk [vmem:[%s325_s14] sm:$0xff] %vm565_vm0, %v576_v23 }
 0x265   : > { %1121 = shalt.err (!%p1118_p13)
}
 0x266   : > { %918 = dma.vmem_to_hbm [thread:$0]  (%p1329_p0), %s639_s7, 128, %s641_s29, %s612_s15  }
 0x267   : > { %s621_s17 = scalar_lea.hbm %s1435_s5, %s1204_s24  ;;  %s318_s18 = scalar_lea.vmem [#allocation9], %s1349_s30 }
 0x268   : > { %s623_s19 = sshll.u32 %s318_s18, 4  ;;  %s625_s28 = sshll.u32 %s621_s17, 4  ;;  %s624_s19 = int_to_ptr.vmem [resolvable:$true] %s623_s19  ;;  %s626_s28 = int_to_ptr.hbm [resolvable:$true] %s625_s28 }
 0x269   : > { %s608_s0 = scalar_lea.sflag [#allocation5], %s1349_s30  ;;  %s1136_s27 = sshra.s32 %s626_s28, 4  ;;  %s1137_s27 = int_to_ptr.hbm [resolvable:$true] %s1136_s27 }
 0x26a   : > { %s1138_s1 = scalar_lea.hbm %s1137_s27, 1  ;;  %s1142_s15 = scalar_lea.hbm %s1435_s5, 2 }
 0x26b   : > { %p1139_p2 = scmp.ne.s32.totalorder %s1137_s27, %s1138_s1  ;;  %p1143_p11 = scmp.lt.s32.totalorder %s1137_s27, %s1435_s5 }
 0x26c   : > { %p1144_p1 = scmp.lt.s32.totalorder %s1142_s15, %s1138_s1 }
 0x26d   : > { %p1140_p4 = pnand %p1139_p2, %p1329_p0 }
 0x26e   : > { %p1145_p3 = por %p1144_p1, %p1143_p11 }
 0x26f   : > { %p1141_p7 = pneg %p1140_p4 }
 0x271   : > { %p1146_p8 = pnand %p1145_p3, %p1141_p7 }
 0x2e7   : > { %v603_v24 = vpop.f32.mrf.mxu3 }
 0x2e8   : > { %606 = vst [vmem:[%s318_s18] sm:$0x1] %v603_v24 }
 0x2e9   : > { %1149 = shalt.err (!%p1146_p8)
}
 0x2ea   : > { %917 = dma.vmem_to_hbm [thread:$0]  (%p1329_p0), %s624_s19, 16, %s626_s28, %s608_s0  }
 0x2eb PF: > { %s652_s30 = sand.u32 1, %s1192_s21   ;;  %p933_p9 = pnand %p774_p6, %p1336_p5 }
 0x2ec   : > { %s653_s9 = scalar_lea.sflag [#allocation5], %s652_s30 }
 0x2ed   : > { %p934_p10 = pneg %p933_p9 }
 0x2ef   : > { %1183 = dma.done.wait (%p934_p10), %s653_s9, 16  }
 0x2f0   : > { %1185 = vsyncadd (%p934_p10), %s653_s9, 4294967280  ;;  %s662_s13 = scalar_lea.sflag [#allocation11], %s652_s30 }
 0x2f1   : > { %1187 = dma.done.wait (%p934_p10), %s662_s13, 128  }
 0x2f2   : > { %1189 = vsyncadd (%p934_p10), %s662_s13, 4294967168  ;;  %s27_s26 = sadd.s32 1, %s1212_s26   ;;  %s1446_s21 = smov %s1196_s22 }
 0x2f3   : > { %p24_p12 = scmp.ge.s32.totalorder %s27_s26, 4   ;;  %s1447_s22 = smov %s1200_s23 }
 0x2f4   : > { %s1448_s23 = smov %s1334_s11  ;;  %s1449_s24 = smov %s1208_s25 }
 0x2f5   : > { %s1450_s25 = smov %s1452_s20  ;;  %26 = sbr.rel (!%p24_p12) target bundleno = 12 (0xc), region = 119 }
 0x2fa   :  { %668 = vsyncpa [#allocation4], 1 }
 0x2fb   :  { %670 = vsyncpa [#allocation4 + $0x1], 1 }
 0x2fc   :  { %671 = vsyncpa [#allocation7], 1 }
 0x2fd   :  { %672 = vsyncpa [#allocation5], 1 }
 0x2fe   :  { %674 = vsyncpa [#allocation5 + $0x1], 1 }
 0x2ff   :  { %675 = vsyncpa [#allocation11], 1 }
 0x300   :  { %677 = vsyncpa [#allocation11 + $0x1], 1 }

</bundles_post_ra>
